<compile_context>
chip_gen: v7x
topology: tpu7x:2x2x1
jax: 0.10.0
libtpu: 0.0.40
codegen_flags: <defaults>
</compile_context>

<pallas_src>
import functools

import jax
import jax.numpy as jnp
from jax.experimental import pallas as pl
from jax.experimental.pallas import tpu as pltpu


_VMEM_LIMIT = 48 * 1024 * 1024  # stay well under v7x's 64 MiB physical VMEM


def _pick_row_tile(n_rows, max_tm=512):
    """Row tile for the patch GEMM: full extent if small, else a multiple of 8
    that divides n_rows (keeps blocks aligned and VMEM bounded)."""
    if n_rows <= max_tm:
        return n_rows
    for tm in range(max_tm, 7, -8):
        if n_rows % tm == 0:
            return tm
    return n_rows


def _pick_col_tile(n_cols, max_tn=512):
    """Class tile for the classifier: full extent if small, else a multiple of
    128 (lane-dense stores) that divides n_cols."""
    if n_cols <= max_tn:
        return n_cols
    for tn in range(max_tn, 127, -128):
        if n_cols % tn == 0:
            return tn
    return n_cols


# ----------------------------------------------------------------------------
# Kernel 1: fused patch-embed GEMM + bias + pos-embed + SIE camera embed
#   tok[b, j*TM:(j+1)*TM, :] =
#       patches[b, rows, :] @ W + (bias + sie*cv[cam[b]]) + pos_embed[1 + rows]
# ----------------------------------------------------------------------------
def _patch_embed_kernel(p_ref, w_ref, pos_ref, add_ref, o_ref):
    # p_ref  : (1, TM, Cpp) bf16  patch rows of (batch b, row-tile j)
    # w_ref  : (Cpp, D)     bf16  flattened Conv2d weight (C,P,P row-major)
    # pos_ref: (TM, D)      f32   positional-embedding rows (patch part)
    # add_ref: (1, 1, D)    f32   per-batch addend = conv bias + SIE cam embed
    # o_ref  : (1, TM, D)   f32
    acc = jnp.dot(p_ref[0], w_ref[...], preferred_element_type=jnp.float32)
    o_ref[0, :, :] = (acc + pos_ref[...] + add_ref[0]).astype(o_ref.dtype)


def patch_embed_tokens(patches, w_patch, pos_patch, add_b,
                       *, compute_dtype=jnp.bfloat16, tm=None):
    # patches: (B, Np, Cpp), w_patch: (Cpp, D), pos_patch: (Np, D),
    # add_b: (B, 1, D)  ->  tok: (B, Np, D) f32
    B, Np, Cpp = patches.shape
    D = w_patch.shape[1]
    if tm is None:
        tm = _pick_row_tile(Np)
    grid = (B, Np // tm)
    return pl.pallas_call(
        _patch_embed_kernel,
        out_shape=jax.ShapeDtypeStruct((B, Np, D), jnp.float32),
        grid=grid,
        in_specs=[
            pl.BlockSpec((1, tm, Cpp), lambda b, j: (b, j, 0)),
            pl.BlockSpec((Cpp, D), lambda b, j: (0, 0)),
            pl.BlockSpec((tm, D), lambda b, j: (j, 0)),
            pl.BlockSpec((1, 1, D), lambda b, j: (b, 0, 0)),
        ],
        out_specs=pl.BlockSpec((1, tm, D), lambda b, j: (b, j, 0)),
        compiler_params=pltpu.CompilerParams(
            dimension_semantics=("parallel", "parallel"),
            vmem_limit_bytes=_VMEM_LIMIT,
        ),
    )(patches.astype(compute_dtype), w_patch.astype(compute_dtype),
      pos_patch, add_b)


# ----------------------------------------------------------------------------
# Kernel 2: build_transformer head
#   feat      = BN1d(global_feat)   (batch stats, eps=1e-5)
#   cls_score = feat @ W_cls^T      (tiled over classes)
# ----------------------------------------------------------------------------
def _head_kernel(g_ref, bn_ref, wct_ref, cls_ref):
    # g_ref  : (B, D)  f32   global feature (token 0) -- only (B, D) is DMA'd
    # bn_ref : (2, D)  f32   row 0 = gamma, row 1 = beta (single block)
    # wct_ref: (D, TN) f32   classifier weight slice (transposed)
    # cls_ref: (B, TN) f32
    g = g_ref[...]
    mean = jnp.mean(g, axis=0, keepdims=True)                       # (1, D)
    var = jnp.mean((g - mean) * (g - mean), axis=0, keepdims=True)  # biased var
    feat = (g - mean) * jax.lax.rsqrt(var + 1e-5)
    feat = feat * bn_ref[0:1, :] + bn_ref[1:2, :]
    cls_ref[...] = jnp.dot(
        feat, wct_ref[...], preferred_element_type=jnp.float32
    ).astype(cls_ref.dtype)


def head(global_feat, bn_params, w_cls_t, *, tn=None):
    # global_feat: (B, D), bn_params: (2, D), w_cls_t: (D, num_classes)
    B, D = global_feat.shape
    num_classes = w_cls_t.shape[1]
    if tn is None:
        tn = _pick_col_tile(num_classes)
    grid = (num_classes // tn,)
    return pl.pallas_call(
        _head_kernel,
        out_shape=jax.ShapeDtypeStruct((B, num_classes), jnp.float32),
        grid=grid,
        in_specs=[
            pl.BlockSpec((B, D), lambda j: (0, 0)),
            pl.BlockSpec((2, D), lambda j: (0, 0)),
            pl.BlockSpec((D, tn), lambda j: (0, j)),
        ],
        out_specs=pl.BlockSpec((B, tn), lambda j: (0, j)),
        compiler_params=pltpu.CompilerParams(
            dimension_semantics=("parallel",),
            vmem_limit_bytes=_VMEM_LIMIT,
        ),
    )(global_feat, bn_params, w_cls_t)


# ----------------------------------------------------------------------------
# Full forward (training path: returns (x, cls_score, global_feat))
#
# `patch_size` / `sie_xishu` are static Python values (closed over before jit)
# so the patch-unfold reshape sees concrete shapes.
# ----------------------------------------------------------------------------
def build_transformer_forward(params, img, cam_label, *, patch_size, sie_xishu):
    B, C, H, W = img.shape
    P = patch_size

    # --- glue: unfold NCHW image into (B, Np, C*P*P) patch rows -------------
    nh, nw = H // P, W // P
    Np = nh * nw
    patches = img.reshape(B, C, nh, P, nw, P)
    patches = patches.transpose(0, 2, 4, 1, 3, 5)        # (B, nh, nw, C, P, P)
    patches = patches.reshape(B, Np, C * P * P)

    # per-batch addend fused into the patch-embed kernel: conv bias + SIE
    cv = sie_xishu * params["cv_embed"][cam_label]         # (B, D)
    add_b = (params["b_patch"][None, :] + cv)[:, None, :]  # (B, 1, D)

    # --- Pallas: fused patch-embed GEMM + bias + pos-embed + SIE add --------
    tok = patch_embed_tokens(
        patches, params["w_patch"], params["pos_embed"][1:], add_b)  # (B,Np,D)

    # --- glue: single cls-token row (tiny) + concat --------------------------
    cls_row = (params["cls_token"]
               + params["pos_embed"][0][None, None, :]
               + cv[:, None, :])                          # (B, 1, D)
    x = jnp.concatenate([cls_row, tok], axis=1)           # (B, S, D)
    global_feat = cls_row[:, 0, :]                        # == x[:, 0]

    # --- Pallas: BN1d bottleneck + bias-free classifier ----------------------
    cls_score = head(global_feat, params["bn_params"], params["w_cls_t"])
    return x, cls_score, global_feat


def init_params(key, *, in_chans=3, patch_size=16, feat_dim=128,
                num_classes=128, camera_num=4, num_patches=4):
    k1, k2, k3, k4 = jax.random.split(key, 4)
    Cpp = in_chans * patch_size * patch_size
    # Conv2d stem rewritten as GEMM: weight flattened (C, P, P) row-major.
    w_patch = jax.random.normal(k1, (Cpp, feat_dim), jnp.float32) * (
        (2.0 / Cpp) ** 0.5)                               # kaiming fan_in
    b_patch = jnp.zeros((feat_dim,), jnp.float32)
    cls_token = jnp.zeros((1, 1, feat_dim), jnp.float32)
    pos_embed = 0.02 * jax.random.normal(
        k2, (num_patches + 1, feat_dim), jnp.float32)     # trunc_normal approx
    cv_embed = 0.02 * jax.random.normal(
        k3, (camera_num, feat_dim), jnp.float32)          # SIE camera embed
    # classifier: nn.Linear(feat_dim, num_classes, bias=False), std=0.001
    w_cls = 0.001 * jax.random.normal(k4, (num_classes, feat_dim), jnp.float32)
    # bottleneck BatchNorm1d: weights_init_kaiming -> gamma=1, beta=0
    bn_params = jnp.stack([jnp.ones((feat_dim,), jnp.float32),
                           jnp.zeros((feat_dim,), jnp.float32)])   # (2, D)
    return dict(
        w_patch=w_patch, b_patch=b_patch, cls_token=cls_token,
        pos_embed=pos_embed, cv_embed=cv_embed,
        w_cls_t=w_cls.T, bn_params=bn_params,
    )


if __name__ == "__main__":
    key = jax.random.PRNGKey(0)
    kp, kx = jax.random.split(key)

    # Small but TPU-friendly shapes: D and num_classes lane-dense (mult of 128)
    B, C, H, W = 2, 3, 32, 32          # 32/16 = 2 -> 4 patches + cls -> S=5
    P = 16
    feat_dim, num_classes, camera_num = 128, 128, 4
    sie_xishu = 1.5
    Np = (H // P) * (W // P)

    params = init_params(kp, in_chans=C, patch_size=P, feat_dim=feat_dim,
                         num_classes=num_classes, camera_num=camera_num,
                         num_patches=Np)

    img = jax.random.normal(kx, (B, C, H, W), jnp.float32)
    cam_label = jnp.array([0, 1], dtype=jnp.int32)

    fwd = jax.jit(functools.partial(build_transformer_forward,
                                    patch_size=P, sie_xishu=sie_xishu))
    x, cls_score, global_feat = fwd(params, img, cam_label)
    jax.block_until_ready((x, cls_score, global_feat))

    # ---- pure-JAX reference (operands rounded to bf16 like the MXU path) ----
    patches = img.reshape(B, C, H // P, P, W // P, P)
    patches = patches.transpose(0, 2, 4, 1, 3, 5).reshape(B, Np, C * P * P)
    p_b = patches.astype(jnp.bfloat16).astype(jnp.float32)
    w_b = params["w_patch"].astype(jnp.bfloat16).astype(jnp.float32)
    cv = sie_xishu * params["cv_embed"][cam_label]
    tok_ref = (jnp.einsum("bnc,cd->bnd", p_b, w_b)
               + params["b_patch"][None, None, :]
               + params["pos_embed"][1:][None, :, :]
               + cv[:, None, :])
    cls_row_ref = (params["cls_token"]
                   + params["pos_embed"][0][None, None, :]
                   + cv[:, None, :])
    x_ref = jnp.concatenate([cls_row_ref, tok_ref], axis=1)
    assert jnp.allclose(x, x_ref, atol=5e-3, rtol=5e-3)

    # head reference (f32): training-mode BN (biased var) + bias-free linear
    g_ref = x[:, 0]
    m = g_ref.mean(0, keepdims=True)
    v = ((g_ref - m) ** 2).mean(0, keepdims=True)
    feat_ref = (g_ref - m) / jnp.sqrt(v + 1e-5)           # gamma=1, beta=0
    cls_ref = feat_ref @ params["w_cls_t"]
    assert jnp.allclose(global_feat, g_ref, atol=1e-6)
    assert jnp.allclose(cls_score, cls_ref, atol=1e-4)

    assert x.shape == (B, Np + 1, feat_dim)
    assert cls_score.shape == (B, num_classes)
    assert global_feat.shape == (B, feat_dim)

    print("KERNEL_OK")
</pallas_src>

<mosaic_0001>
module attributes {stable_mosaic.version = 11 : i64} {
  func.func @_head_kernel(%arg0: i32, %arg1: memref<2x128xf32, #tpu.memory_space<vmem>>, %arg2: memref<2x128xf32, #tpu.memory_space<vmem>>, %arg3: memref<128x128xf32, #tpu.memory_space<vmem>>, %arg4: memref<2x128xf32, #tpu.memory_space<vmem>>) attributes {dimension_semantics = [#tpu.dimension_semantics<parallel>], iteration_bounds = array<i64: 1>, scalar_prefetch = 0 : i64, scratch_operands = 0 : i64, tpu.core_type = #tpu.core_type<tc>, window_params = [{pipeline_mode = #tpu.pipeline_mode<synchronous>, transform_indices = @transform_0, window_bounds = array<i64: 2, 128>}, {pipeline_mode = #tpu.pipeline_mode<synchronous>, transform_indices = @transform_1, window_bounds = array<i64: 2, 128>}, {transform_indices = @transform_2, window_bounds = array<i64: 128, 128>}, {transform_indices = @transform_3, window_bounds = array<i64: 2, 128>}]} {
    %c0 = arith.constant 0 : index
    %c0_0 = arith.constant 0 : index
    %0 = vector.load %arg1[%c0, %c0_0] : memref<2x128xf32, #tpu.memory_space<vmem>>, vector<2x128xf32>
    %cst = arith.constant dense<0.000000e+00> : vector<128xf32>
    %1 = vector.multi_reduction <add>, %0, %cst [0] : vector<2x128xf32> to vector<128xf32>
    %2 = vector.shape_cast %1 : vector<128xf32> to vector<1x128xf32>
    %cst_1 = arith.constant 2.000000e+00 : f32
    %3 = vector.broadcast %cst_1 : f32 to vector<1x128xf32>
    %4 = arith.divf %2, %3 : vector<1x128xf32>
    %5 = vector.broadcast %4 : vector<1x128xf32> to vector<2x128xf32>
    %6 = arith.subf %0, %5 : vector<2x128xf32>
    %7 = vector.broadcast %4 : vector<1x128xf32> to vector<2x128xf32>
    %8 = arith.subf %0, %7 : vector<2x128xf32>
    %9 = arith.mulf %6, %8 : vector<2x128xf32>
    %cst_2 = arith.constant dense<0.000000e+00> : vector<128xf32>
    %10 = vector.multi_reduction <add>, %9, %cst_2 [0] : vector<2x128xf32> to vector<128xf32>
    %11 = vector.shape_cast %10 : vector<128xf32> to vector<1x128xf32>
    %cst_3 = arith.constant 2.000000e+00 : f32
    %12 = vector.broadcast %cst_3 : f32 to vector<1x128xf32>
    %13 = arith.divf %11, %12 : vector<1x128xf32>
    %14 = vector.broadcast %4 : vector<1x128xf32> to vector<2x128xf32>
    %15 = arith.subf %0, %14 : vector<2x128xf32>
    %cst_4 = arith.constant 9.99999974E-6 : f32
    %16 = vector.broadcast %cst_4 : f32 to vector<1x128xf32>
    %17 = arith.addf %13, %16 : vector<1x128xf32>
    %18 = math.rsqrt %17 : vector<1x128xf32>
    %19 = vector.broadcast %18 : vector<1x128xf32> to vector<2x128xf32>
    %20 = arith.mulf %15, %19 : vector<2x128xf32>
    %c0_5 = arith.constant 0 : index
    %c0_6 = arith.constant 0 : index
    %21 = vector.load %arg2[%c0_5, %c0_6] : memref<2x128xf32, #tpu.memory_space<vmem>>, vector<1x128xf32>
    %22 = vector.broadcast %21 : vector<1x128xf32> to vector<2x128xf32>
    %23 = arith.mulf %20, %22 : vector<2x128xf32>
    %c1 = arith.constant 1 : index
    %c0_7 = arith.constant 0 : index
    %24 = vector.load %arg2[%c1, %c0_7] : memref<2x128xf32, #tpu.memory_space<vmem>>, vector<1x128xf32>
    %25 = vector.broadcast %24 : vector<1x128xf32> to vector<2x128xf32>
    %26 = arith.addf %23, %25 : vector<2x128xf32>
    %c0_8 = arith.constant 0 : index
    %c0_9 = arith.constant 0 : index
    %27 = vector.load %arg3[%c0_8, %c0_9] : memref<128x128xf32, #tpu.memory_space<vmem>>, vector<128x128xf32>
    %cst_10 = arith.constant dense<0.000000e+00> : vector<2x128xf32>
    %28 = tpu.matmul %26, %27, %cst_10 {dimension_numbers = #tpu.dot_dimension_numbers<[1], [0], [0], [1], [0, 0, 1, 1], [], []>} : vector<2x128xf32>, vector<128x128xf32>, vector<2x128xf32> -> vector<2x128xf32>
    %c0_11 = arith.constant 0 : index
    %c0_12 = arith.constant 0 : index
    %29 = vector.load %arg4[%c0_11, %c0_12] : memref<2x128xf32, #tpu.memory_space<vmem>>, vector<2x128xf32>
    tpu.vector_store %arg4[%c0_11, %c0_12], %28 {strides = array<i32>} : memref<2x128xf32, #tpu.memory_space<vmem>>, vector<2x128xf32>,
    return
  }
  func.func @transform_0(%arg0: i32) -> (i32, i32) {
    %c0_i32 = arith.constant 0 : i32
    %c0_i32_0 = arith.constant 0 : i32
    %c0_i32_1 = arith.constant 0 : i32
    return %c0_i32, %c0_i32_0 : i32, i32
  }
  func.func @transform_1(%arg0: i32) -> (i32, i32) {
    %c0_i32 = arith.constant 0 : i32
    %c0_i32_0 = arith.constant 0 : i32
    %c0_i32_1 = arith.constant 0 : i32
    return %c0_i32, %c0_i32_0 : i32, i32
  }
  func.func @transform_2(%arg0: i32) -> (i32, i32) {
    %c0_i32 = arith.constant 0 : i32
    %c0_i32_0 = arith.constant 0 : i32
    return %c0_i32, %arg0 : i32, i32
  }
  func.func @transform_3(%arg0: i32) -> (i32, i32) {
    %c0_i32 = arith.constant 0 : i32
    %c0_i32_0 = arith.constant 0 : i32
    return %c0_i32, %arg0 : i32, i32
  }
}

module attributes {stable_mosaic.version = 11 : i64} {
  func.func @_patch_embed_kernel(%arg0: i32, %arg1: i32, %arg2: memref<1x4x768xbf16, #tpu.memory_space<vmem>>, %arg3: memref<768x128xbf16, #tpu.memory_space<vmem>>, %arg4: memref<4x128xf32, #tpu.memory_space<vmem>>, %arg5: memref<1x1x128xf32, #tpu.memory_space<vmem>>, %arg6: memref<1x4x128xf32, #tpu.memory_space<vmem>>) attributes {dimension_semantics = [#tpu.dimension_semantics<parallel>, #tpu.dimension_semantics<parallel>], iteration_bounds = array<i64: 2, 1>, scalar_prefetch = 0 : i64, scratch_operands = 0 : i64, tpu.core_type = #tpu.core_type<tc>, window_params = [{transform_indices = @transform_0, window_bounds = array<i64: 1, 4, 768>}, {pipeline_mode = #tpu.pipeline_mode<synchronous>, transform_indices = @transform_1, window_bounds = array<i64: 768, 128>}, {transform_indices = @transform_2, window_bounds = array<i64: 4, 128>}, {transform_indices = @transform_3, window_bounds = array<i64: 1, 1, 128>}, {transform_indices = @transform_4, window_bounds = array<i64: 1, 4, 128>}]} {
    %c0 = arith.constant 0 : index
    %c0_0 = arith.constant 0 : index
    %c0_1 = arith.constant 0 : index
    %0 = vector.load %arg2[%c0, %c0_0, %c0_1] : memref<1x4x768xbf16, #tpu.memory_space<vmem>>, vector<1x4x768xbf16>
    %1 = vector.shape_cast %0 : vector<1x4x768xbf16> to vector<4x768xbf16>
    %c0_2 = arith.constant 0 : index
    %c0_3 = arith.constant 0 : index
    %2 = vector.load %arg3[%c0_2, %c0_3] : memref<768x128xbf16, #tpu.memory_space<vmem>>, vector<768x128xbf16>
    %cst = arith.constant dense<0.000000e+00> : vector<4x128xf32>
    %3 = tpu.matmul %1, %2, %cst {dimension_numbers = #tpu.dot_dimension_numbers<[1], [0], [0], [1], [0, 0, 1, 1], [], []>} : vector<4x768xbf16>, vector<768x128xbf16>, vector<4x128xf32> -> vector<4x128xf32>
    %c0_4 = arith.constant 0 : index
    %c0_5 = arith.constant 0 : index
    %4 = vector.load %arg4[%c0_4, %c0_5] : memref<4x128xf32, #tpu.memory_space<vmem>>, vector<4x128xf32>
    %5 = arith.addf %3, %4 : vector<4x128xf32>
    %c0_6 = arith.constant 0 : index
    %c0_7 = arith.constant 0 : index
    %c0_8 = arith.constant 0 : index
    %6 = vector.load %arg5[%c0_6, %c0_7, %c0_8] : memref<1x1x128xf32, #tpu.memory_space<vmem>>, vector<1x1x128xf32>
    %7 = vector.shape_cast %6 : vector<1x1x128xf32> to vector<1x128xf32>
    %8 = vector.broadcast %7 : vector<1x128xf32> to vector<4x128xf32>
    %9 = arith.addf %5, %8 : vector<4x128xf32>
    %c0_9 = arith.constant 0 : index
    %c0_10 = arith.constant 0 : index
    %c0_11 = arith.constant 0 : index
    %10 = vector.load %arg6[%c0_9, %c0_10, %c0_11] : memref<1x4x128xf32, #tpu.memory_space<vmem>>, vector<1x4x128xf32>
    %11 = vector.shape_cast %10 : vector<1x4x128xf32> to vector<4x128xf32>
    %12 = vector.shape_cast %9 : vector<4x128xf32> to vector<1x4x128xf32>
    tpu.vector_store %arg6[%c0_9, %c0_10, %c0_11], %12 {strides = array<i32>} : memref<1x4x128xf32, #tpu.memory_space<vmem>>, vector<1x4x128xf32>,
    return
  }
  func.func @transform_0(%arg0: i32, %arg1: i32) -> (i32, i32, i32) {
    %c0_i32 = arith.constant 0 : i32
    %c0_i32_0 = arith.constant 0 : i32
    return %arg0, %arg1, %c0_i32 : i32, i32, i32
  }
  func.func @transform_1(%arg0: i32, %arg1: i32) -> (i32, i32) {
    %c0_i32 = arith.constant 0 : i32
    %c0_i32_0 = arith.constant 0 : i32
    %c0_i32_1 = arith.constant 0 : i32
    return %c0_i32, %c0_i32_0 : i32, i32
  }
  func.func @transform_2(%arg0: i32, %arg1: i32) -> (i32, i32) {
    %c0_i32 = arith.constant 0 : i32
    %c0_i32_0 = arith.constant 0 : i32
    return %arg1, %c0_i32 : i32, i32
  }
  func.func @transform_3(%arg0: i32, %arg1: i32) -> (i32, i32, i32) {
    %c0_i32 = arith.constant 0 : i32
    %c0_i32_0 = arith.constant 0 : i32
    %c0_i32_1 = arith.constant 0 : i32
    return %arg0, %c0_i32, %c0_i32_0 : i32, i32, i32
  }
  func.func @transform_4(%arg0: i32, %arg1: i32) -> (i32, i32, i32) {
    %c0_i32 = arith.constant 0 : i32
    %c0_i32_0 = arith.constant 0 : i32
    return %arg0, %arg1, %c0_i32 : i32, i32, i32
  }
}

</mosaic_0001>

<bundles_post_ra>
// kernel: build_transformer_forward.3
= control target key start
LH: loop header
LB: loop body
LE: loop exit
PB: predicated region body
PF: predicated region fallthrough
CT: control target
= control target key end

     0   :  { %v260_v3 = vmov 0.0|0.0   ;;  %vm261_vm0 = vmmov 0   ;;  %v262_v6 = vmov 0.0   ;;  %vm16_vm1 = vcmask 1041408   ;;  %s355_s0 = inlined_call_operand.vmem [shape: f32[2,128], index: 0, kind: input, shape index: {}]   ;;  %s356_s1 = inlined_call_operand.vmem [shape: f32[2,128], index: 1, kind: input, shape index: {}]   ;;  %s357_s2 = inlined_call_operand.vmem [shape: f32[128,128], index: 2, kind: input, shape index: {}]   ;;  %s358_s3 = inlined_call_operand.hbm [shape: f32[2,128], index: 3, kind: output, shape index: {}]  }
   0x1   :  { %v51_v0 = vld [vmem:[%s357_s2] sm:$0xff]  ;;  %v52_v1 = vld [vmem:[%s357_s2 + $0x8] sm:$0xff]  ;;  %v53_v2 = vld [vmem:[%s357_s2 + $0x10] sm:$0xff]  ;;  %206 = vmatprep.subr.bf16.mxu0 %v260_v3  ;;  %203 = vmatprep.mubr.msk.f32.mxu0 %vm261_vm0, %v262_v6 }
   0x2   :  { %v207_v4 = vpack.c.bf16 %v52_v1, %v51_v0  ;;  %v54_v5 = vld [vmem:[%s357_s2 + $0x18] sm:$0xff]  ;;  %v55_v8 = vld [vmem:[%s357_s2 + $0x20] sm:$0xff]  ;;  %v56_v9 = vld [vmem:[%s357_s2 + $0x28] sm:$0xff] }
   0x3   :  { %v210_v7 = vpack.c.bf16 %v54_v5, %v53_v2  ;;  %v15_v10 = vld [vmem:[%s355_s0] sm:$0x3] }
   0x4   :  { %208 = vmatpush3.bf16.msra.mxu0 %v207_v4  ;;  %v17_v11 = vsel %vm16_vm1, %v15_v10, 0.0 }
   0x5   :  { %209 = vmatprep.subr.bf16.mxu0 %v260_v3 }
   0x6   :  { %8 = vsyncpa [#allocation3], 0  ;;  %v213_v12 = vpack.c.bf16 %v56_v9, %v55_v8  ;;  %v18_v13 = vrot.slane %v17_v11, 4  ;;  %v57_v14 = vld [vmem:[%s357_s2 + $0x30] sm:$0xff]  ;;  %v58_v15 = vld [vmem:[%s357_s2 + $0x38] sm:$0xff]  ;;  %s263_s21 = smov [#allocation2]  }
   0x7   :  { %v216_v17 = vpack.c.bf16 %v58_v15, %v57_v14  ;;  %v59_v19 = vld [vmem:[%s357_s2 + $0x40] sm:$0xff]  ;;  %v60_v20 = vld [vmem:[%s357_s2 + $0x48] sm:$0xff]  ;;  %v61_v24 = vld [vmem:[%s357_s2 + $0x50] sm:$0xff]  ;;  %s144_s22 = sshll.u32 %s263_s21, 4  ;;  %s145_s22 = int_to_ptr.vmem [resolvable:$true] %s144_s22 }
   0x8   :  { %211 = vmatpush3.bf16.msra.mxu0 %v210_v7  ;;  %v19_v16 = vadd.f32 %v18_v13, %v17_v11  ;;  %v219_v22 = vpack.c.bf16 %v60_v20, %v59_v19  ;;  %v62_v25 = vld [vmem:[%s357_s2 + $0x58] sm:$0xff]  ;;  %v63_v29 = vld [vmem:[%s357_s2 + $0x60] sm:$0xff]  ;;  %v64_v30 = vld [vmem:[%s357_s2 + $0x68] sm:$0xff]  ;;  %s236_s23 = scalar_lea.vmem %s145_s22, 32  ;;  %p241_p1 = scmp.lt.s32.totalorder %s145_s22, %s145_s22 }
   0x9   :  { %212 = vmatprep.subr.bf16.mxu0 %v260_v3  ;;  %v222_v27 = vpack.c.bf16 %v62_v25, %v61_v24  ;;  %v225_v32 = vpack.c.bf16 %v64_v30, %v63_v29  ;;  %v65_v34 = vld [vmem:[%s357_s2 + $0x70] sm:$0xff]  ;;  %v66_v35 = vld [vmem:[%s357_s2 + $0x78] sm:$0xff]  ;;  %v152_v47 = vld [vmem:[%s356_s1] ss:$0 sm:$0xff]  ;;  %p237_p0 = scmp.ne.s32.totalorder %s145_s22, %s236_s23  ;;  %p242_p2 = scmp.lt.s32.totalorder %s236_s23, %s236_s23 }
   0xa   :  { %v20_v18 = vrot.slane %v19_v16, 2  ;;  %v228_v38 = vpack.c.bf16 %v66_v35, %v65_v34  ;;  %v153_v49 = vld [vmem:[%s356_s1 + $0x1] ss:$0 sm:$0xff] }
   0xb   :  { %p243_p3 = por %p242_p2, %p241_p1 }
   0xc   :  { %214 = vmatpush3.bf16.msra.mxu0 %v213_v12  ;;  %v21_v21 = vadd.f32 %v20_v18, %v19_v16 }
   0xd   :  { %215 = vmatprep.subr.bf16.mxu0 %v260_v3  ;;  %p244_p4 = pnand %p243_p3, %p237_p0 }
   0xe   :  { %v22_v23 = vrot.slane %v21_v21, 1 }
  0x10   :  { %217 = vmatpush3.bf16.msra.mxu0 %v216_v17  ;;  %v23_v26 = vadd.f32 %v22_v23, %v21_v21 }
  0x11   :  { %218 = vmatprep.subr.bf16.mxu0 %v260_v3 }
  0x12   :  { %v25_v28 = vmul.f32 0.5, %v23_v26 }
  0x14   :  { %220 = vmatpush3.bf16.msra.mxu0 %v219_v22  ;;  %v26_v31 = vsub.f32 %v15_v10, %v25_v28 }
  0x15   :  { %221 = vmatprep.subr.bf16.mxu0 %v260_v3 }
  0x16   :  { %v27_v33 = vmul.f32 %v26_v31, %v26_v31 }
  0x18   :  { %223 = vmatpush3.bf16.msra.mxu0 %v222_v27  ;;  %v28_v36 = vsel %vm16_vm1, %v27_v33, 0.0 }
  0x19   :  { %224 = vmatprep.subr.bf16.mxu0 %v260_v3  ;;  %v29_v37 = vrot.slane %v28_v36, 4 }
  0x1b   :  { %v30_v39 = vadd.f32 %v29_v37, %v28_v36 }
  0x1c   :  { %226 = vmatpush3.bf16.msra.mxu0 %v225_v32 }
  0x1d   :  { %227 = vmatprep.subr.bf16.mxu0 %v260_v3  ;;  %v31_v40 = vrot.slane %v30_v39, 2 }
  0x1f   :  { %v32_v41 = vadd.f32 %v31_v40, %v30_v39 }
  0x20   :  { %229 = vmatpush3.bf16.msra.mxu0 %v228_v38 }
  0x21   :  { %v33_v42 = vrot.slane %v32_v41, 1 }
  0x23   :  { %v34_v43 = vadd.f32 %v33_v42, %v32_v41 }
  0x25   :  { %v35_v44 = vmul.f32 0.5, %v34_v43 }
  0x27   :  { %v36_v45 = vadd.f32 1e-05, %v35_v44 }
  0x29   :  { %234 = vrsqrt.f32 %v36_v45 }
  0x33   :  { %v235_v46 = vpop.eup %234 }
  0x34   :  { %v38_v48 = vmul.f32 %v235_v46, %v26_v31 }
  0x36   :  { %v44_v50 = vmul.f32 %v152_v47, %v38_v48 }
  0x38   :  { %v50_v51 = vadd.f32 %v153_v49, %v44_v50 }
  0x3a   :  { %204 = vmatmul.mubr.f32.vlgmr.msra.gmra.mrb[0].mxu0 %v50_v51 }
 0x10d   :  { %v133_v52 = vpop.f32.mrb[0].mxu0 }
 0x10e   :  { %137 = vst [vmem:[#allocation2] sm:$0x3] %v133_v52  ;;  %v205_v53 = vpop.f32.mrb[1].mxu0 }
 0x10f   :  { %247 = shalt.err (!%p244_p4)
}
 0x110   :  { %s248_s1 = scalar_lea.hbm %s358_s3, 32 }
 0x111   :  { %p249_p5 = scmp.ne.s32.totalorder %s358_s3, %s248_s1  ;;  %p252_p6 = scmp.lt.u32.totalorder %s248_s1, %s358_s3 }
 0x113   :  { %p254_p7 = pnand %p252_p6, %p249_p5 }
 0x115   :  { %257 = shalt.err (!%p254_p7)
}
 0x116   :  { %147 = dma.vmem_to_hbm [thread:$0]  %s145_s22, 32, %s358_s3, [#allocation3]  }
 0x117   :  { %258 = dma.done.wait [#allocation3], 32  }
 0x118   :  { %259 = vsyncadd [#allocation3], 4294967264 }
 0x119   :  { %151 = vsyncpa [#allocation3], 1 }

// kernel: build_transformer_forward.2
= control target key start
LH: loop header
LB: loop body
LE: loop exit
PB: predicated region body
PF: predicated region fallthrough
CT: control target
= control target key end

     0   :  { %s1167_s15 = smov 0   ;;  %s1169_s16 = smov 0   ;;  %s1363_s0 = inlined_call_operand.vmem [shape: bf16[2,4,768], index: 0, kind: input, shape index: {}]   ;;  %s1364_s1 = inlined_call_operand.vmem [shape: bf16[768,128], index: 1, kind: input, shape index: {}]   ;;  %s1365_s2 = inlined_call_operand.vmem [shape: f32[4,128], index: 2, kind: input, shape index: {}]   ;;  %s1366_s3 = inlined_call_operand.vmem [shape: f32[2,1,128], index: 3, kind: input, shape index: {}]   ;;  %s1367_s4 = inlined_call_operand.vmem [shape: f32[2,4,128], index: 4, kind: output, shape index: {}]  }
   0x1   :  { %s1171_s17 = smov 0  }
   0x2 LB: > { %s26_s18 = sadd.s32 1, %s1135_s16  ;;  %p921_p0 = scmp.ge.s32.totalorder %s1139_s17, 1  ;;  %s1139_s17 = sphi %s1171_s17, %s14_s17   ;;  %s1135_s16 = sphi %s1169_s16, %s1369_s16   ;;  %s1131_s15 = sphi %s1167_s15, %s1368_s15  }
   0x3   : > { %p28_p1 = scmp.ge.s32.totalorder %s26_s18, 2  ;;  %p199_p2 = scmp.lt.s32.totalorder %s1139_s17, 3 }
   0x5   : > { %s1371_s18 = smov (%p28_p1, %s26_s18), 0  ;;  %p200_p3 = pnand %p921_p0, %p199_p2 }
   0x6   : > { %v1068_v0 = vld [vmem:[%s1364_s1 + $0x40] sm:$0xff] (!%p200_p3)   ;;  %v1072_v4 = vld [vmem:[%s1364_s1 + $0x48] sm:$0xff] (!%p200_p3)   ;;  %v1076_v8 = vld [vmem:[%s1364_s1 + $0x50] sm:$0xff] (!%p200_p3)   ;;  %p238_p4 = scmp.lt.s32.totalorder (!%p200_p3), %s1131_s15, 1  ;;  %v367_v27 = vlaneseq (!%p200_p3)  ;;  %v1141_v35 = vmov (!%p200_p3), 1983009808  }
   0x7   : > { %203 = sbr.rel (%p200_p3) target bundleno = 291 (0x123), region = 36  ;;  %v1069_v1 = vld [vmem:[%s1364_s1] sm:$0xff] (!%p200_p3)   ;;  %976 = vmatprep.subr.bf16.mxu0 (!%p200_p3), %v1068_v0  ;;  %v1073_v5 = vld [vmem:[%s1364_s1 + $0x8] sm:$0xff] (!%p200_p3)   ;;  %v1077_v9 = vld [vmem:[%s1364_s1 + $0x10] sm:$0xff] (!%p200_p3)   ;;  %v365_v36 = vunpack.c.l.s4 (!%p200_p3), %v1141_v35 }
   0x8   : > { %v1070_v2 = vld [vmem:[%s1364_s1 + $0xc0] sm:$0xff] (!%p200_p3)   ;;  %977 = vmatpush3.bf16.msra.mxu0 (!%p200_p3), %v1069_v1  ;;  %v1074_v6 = vld [vmem:[%s1364_s1 + $0xc8] sm:$0xff] (!%p200_p3)   ;;  %v1078_v10 = vld [vmem:[%s1364_s1 + $0xd0] sm:$0xff] (!%p200_p3)   ;;  %v368_v32 = vshrl.u32 (!%p200_p3), %v367_v27, 7 }
   0x9   : > { %v1071_v3 = vld [vmem:[%s1364_s1 + $0x80] sm:$0xff] (!%p200_p3)   ;;  %998 = vmatprep.subr.bf16.mxu1 (!%p200_p3), %v1070_v2  ;;  %978 = vmatprep.subr.bf16.mxu0 (!%p200_p3), %v1072_v4  ;;  %v1075_v7 = vld [vmem:[%s1364_s1 + $0x88] sm:$0xff] (!%p200_p3)   ;;  %v1079_v11 = vld [vmem:[%s1364_s1 + $0x90] sm:$0xff] (!%p200_p3)   ;;  %v366_v38 = vunpack.c.0.s8 (!%p200_p3), %v365_v36 }
   0xa   : > { %999 = vmatpush3.bf16.msra.mxu1 (!%p200_p3), %v1071_v3  ;;  %v1080_v12 = vld [vmem:[%s1364_s1 + $0x58] sm:$0xff] (!%p200_p3)   ;;  %v1084_v16 = vld [vmem:[%s1364_s1 + $0x60] sm:$0xff] (!%p200_p3)   ;;  %v1088_v20 = vld [vmem:[%s1364_s1 + $0x68] sm:$0xff] (!%p200_p3)  }
   0xb   : > { %1000 = vmatprep.subr.bf16.mxu1 (!%p200_p3), %v1074_v6  ;;  %v1081_v13 = vld [vmem:[%s1364_s1 + $0x18] sm:$0xff] (!%p200_p3)   ;;  %v1085_v17 = vld [vmem:[%s1364_s1 + $0x20] sm:$0xff] (!%p200_p3)   ;;  %v1089_v21 = vld [vmem:[%s1364_s1 + $0x28] sm:$0xff] (!%p200_p3)   ;;  %v369_v40 = vsub.s32 (!%p200_p3), %v366_v38, %v368_v32 }
   0xc   : > { %979 = vmatpush3.bf16.msra.mxu0 (!%p200_p3), %v1073_v5  ;;  %v1082_v14 = vld [vmem:[%s1364_s1 + $0xd8] sm:$0xff] (!%p200_p3)   ;;  %v1086_v18 = vld [vmem:[%s1364_s1 + $0xe0] sm:$0xff] (!%p200_p3)   ;;  %v1090_v22 = vld [vmem:[%s1364_s1 + $0xe8] sm:$0xff] (!%p200_p3)  }
   0xd   : > { %980 = vmatprep.subr.bf16.mxu0 (!%p200_p3), %v1076_v8  ;;  %v1083_v15 = vld [vmem:[%s1364_s1 + $0x98] sm:$0xff] (!%p200_p3)   ;;  %v1087_v19 = vld [vmem:[%s1364_s1 + $0xa0] sm:$0xff] (!%p200_p3)   ;;  %v1091_v23 = vld [vmem:[%s1364_s1 + $0xa8] sm:$0xff] (!%p200_p3)  }
   0xe   : > { %1001 = vmatpush3.bf16.msra.mxu1 %v1075_v7  ;;  %s1373_s15 = smov (!%p238_p4, %s1131_s15), 1  ;;  %v1092_v24 = vld [vmem:[%s1364_s1 + $0x70] sm:$0xff]   ;;  %v1096_v29 = vld [vmem:[%s1364_s1 + $0x78] sm:$0xff]   ;;  %v1100_v37 = vld [vmem:[%s1364_s1 + $0x140] sm:$0xff]  }
   0xf   : > { %1002 = vmatprep.subr.bf16.mxu1 %v1078_v10  ;;  %s1042_s25 = smul.u32 12, %s1373_s15  ;;  %v1093_v25 = vld [vmem:[%s1364_s1 + $0x30] sm:$0xff]   ;;  %v1097_v30 = vld [vmem:[%s1364_s1 + $0x38] sm:$0xff]   ;;  %v1102_v45 = vld [vmem:[%s1364_s1 + $0x100] sm:$0xff]   ;;  %s253_s9 = scalar_lea.vmem %s1366_s3, %s1373_s15 }
  0x10   : > { %981 = vmatpush3.bf16.msra.mxu0 %v1077_v9  ;;  %v1094_v26 = vld [vmem:[%s1364_s1 + $0xf0] sm:$0xff]   ;;  %v1098_v31 = vld [vmem:[%s1364_s1 + $0xf8] sm:$0xff]   ;;  %v1103_v46 = vld [vmem:[%s1364_s1 + $0x148] sm:$0xff]   ;;  %s923_s11 = sshll.u32 %s1373_s15, 2 }
  0x11   : > { %982 = vmatprep.subr.bf16.mxu0 %v1080_v12  ;;  %v1095_v28 = vld [vmem:[%s1364_s1 + $0xb0] sm:$0xff]   ;;  %s1282_s10 = scalar_lea.vmem %s1363_s0, %s1042_s25  ;;  %v1099_v34 = vld [vmem:[%s1364_s1 + $0xb8] sm:$0xff]   ;;  %v1104_v47 = vld [vmem:[%s1364_s1 + $0x108] sm:$0xff]   ;;  %s260_s14 = scalar_lea.vmem %s1367_s4, %s923_s11 }
  0x12   : > { %1003 = vmatpush3.bf16.msra.mxu1 %v1079_v11  ;;  %v262_v33 = vld [vmem:[%s1282_s10] sm:$0xff]  ;;  %v1105_v48 = vld [vmem:[%s1364_s1 + $0x150] sm:$0xff]   ;;  %v924_v50 = vld.sshfl [vmem:[%s1282_s10 + $0x8] sm:$0x33 pattern:$0x76325410] }
  0x13   : > { %1004 = vmatprep.subr.bf16.mxu1 %v1082_v14  ;;  %v363_v39 = vcombine.high %v262_v33, %v262_v33  ;;  %v370_v41 = vrot.slane %v262_v33, %v369_v40  ;;  %v1106_v49 = vld [vmem:[%s1364_s1 + $0x110] sm:$0xff]   ;;  %v1107_v51 = vld [vmem:[%s1364_s1 + $0x158] sm:$0xff]   ;;  %v387_v52 = vcombine.high %v924_v50, %v924_v50  ;;  %v1109_v54 = vld [vmem:[%s1364_s1 + $0x160] sm:$0xff]  }
  0x14   : > { %983 = vmatpush3.bf16.msra.mxu0 %v1081_v13  ;;  %v1108_v53 = vld [vmem:[%s1364_s1 + $0x118] sm:$0xff]   ;;  %v1110_v55 = vld [vmem:[%s1364_s1 + $0x120] sm:$0xff]   ;;  %v1111_v56 = vld [vmem:[%s1364_s1 + $0x168] sm:$0xff]  }
  0x15   : > { %984 = vmatprep.subr.bf16.mxu0 %v1084_v16  ;;  %v377_v42 = vrot.slane %v363_v39, %v369_v40  ;;  %v378_v43 = vcombine.high %v370_v41, %v370_v41  ;;  %v1112_v57 = vld [vmem:[%s1364_s1 + $0x128] sm:$0xff]   ;;  %v1113_v58 = vld [vmem:[%s1364_s1 + $0x170] sm:$0xff]   ;;  %v1115_v60 = vld [vmem:[%s1364_s1 + $0x178] sm:$0xff]  }
  0x16   : > { %1005 = vmatpush3.bf16.msra.mxu1 %v1083_v15  ;;  %v1114_v59 = vld [vmem:[%s1364_s1 + $0x130] sm:$0xff]   ;;  %v1116_v61 = vld [vmem:[%s1364_s1 + $0x138] sm:$0xff]   ;;  %v360_v0 = vld [vmem:[%s1365_s2] sm:$0xf] }
  0x17   : > { %1006 = vmatprep.subr.bf16.mxu1 %v1086_v18  ;;  %v379_v44 = vcombine.high %v377_v42, %v377_v42  ;;  %714 = vmatprep.mubr.bf16.mxu0 %v378_v43  ;;  %v973_v15 = vld [vmem:[%s253_s9] ss:$0 sm:$0xff] }
  0x18   : > { %985 = vmatpush3.bf16.msra.mxu0 %v1085_v17 }
  0x19   : > { %986 = vmatprep.subr.bf16.mxu0 %v1088_v20  ;;  %754 = vmatprep.mubr.bf16.mxu1 %v379_v44 }
  0x1a   : > { %1007 = vmatpush3.bf16.msra.mxu1 %v1087_v19 }
  0x1b   : > { %1008 = vmatprep.subr.bf16.mxu1 %v1090_v22 }
  0x1c   : > { %987 = vmatpush3.bf16.msra.mxu0 %v1089_v21 }
  0x1d   : > { %988 = vmatprep.subr.bf16.mxu0 %v1092_v24 }
  0x1e   : > { %1009 = vmatpush3.bf16.msra.mxu1 %v1091_v23 }
  0x1f   : > { %1010 = vmatprep.subr.bf16.mxu1 %v1094_v26 }
  0x20   : > { %989 = vmatpush3.bf16.msra.mxu0 %v1093_v25 }
  0x21   : > { %990 = vmatprep.subr.bf16.mxu0 %v1096_v29 }
  0x22   : > { %1011 = vmatpush3.bf16.msra.mxu1 %v1095_v28 }
  0x23   : > { %1012 = vmatprep.subr.bf16.mxu1 %v1098_v31 }
  0x24   : > { %991 = vmatpush3.bf16.msra.mxu0 %v1097_v30 }
  0x25   : > { %1020 = vmatprep.subr.bf16.mxu0 %v1100_v37 }
  0x26   : > { %1013 = vmatpush3.bf16.msra.mxu1 %v1099_v34 }
  0x27   : > { %715 = vmatmul.mubr.bf16.vlgmr.msra.gmra.mrb[0].mxu0 %v370_v41 }
  0x28   : > { %1021 = vmatpush3.bf16.msra.mxu0 %v1102_v45  ;;  %794 = vmatprep.mubr.bf16.mxu0 %v387_v52 }
  0x29   : > { %755 = vmatmul.mubr.bf16.vlgmr.msra.gmra.mrb[0].mxu1 %v377_v42  ;;  %1022 = vmatprep.subr.bf16.mxu0 %v1103_v46 }
  0x2c   : > { %1023 = vmatpush3.bf16.msra.mxu0 %v1104_v47 }
  0x2d   : > { %1024 = vmatprep.subr.bf16.mxu0 %v1105_v48 }
  0x30   : > { %1025 = vmatpush3.bf16.msra.mxu0 %v1106_v49 }
  0x31   : > { %1026 = vmatprep.subr.bf16.mxu0 %v1107_v51 }
  0x34   : > { %1027 = vmatpush3.bf16.msra.mxu0 %v1108_v53 }
  0x35   : > { %1028 = vmatprep.subr.bf16.mxu0 %v1109_v54 }
  0x38   : > { %1029 = vmatpush3.bf16.msra.mxu0 %v1110_v55 }
  0x39   : > { %1030 = vmatprep.subr.bf16.mxu0 %v1111_v56 }
  0x3c   : > { %1031 = vmatpush3.bf16.msra.mxu0 %v1112_v57 }
  0x3d   : > { %1032 = vmatprep.subr.bf16.mxu0 %v1113_v58 }
  0x40   : > { %1033 = vmatpush3.bf16.msra.mxu0 %v1114_v59 }
  0x41   : > { %1034 = vmatprep.subr.bf16.mxu0 %v1115_v60 }
  0x44   : > { %1035 = vmatpush3.bf16.msra.mxu0 %v1116_v61 }
  0x47   : > { %795 = vmatmul.mubr.bf16.vlgmr.msra.gmra.mrb[4].mxu0 %v924_v50 }
  0xfa   : > { %v992_v62 = vpop.f32.mrb[0].mxu0 }
  0xfb   : > { %v993_v1 = vpop.f32.mrb[1].mxu0 }
  0xfc   : > { %v1014_v63 = vpop.f32.mrb[0].mxu1  ;;  %v994_v3 = vadd.f32 %v993_v1, %v992_v62  ;;  %v995_v4 = vpop.f32.mrb[2].mxu0 }
  0xfd   : > { %v1015_v2 = vpop.f32.mrb[1].mxu1  ;;  %v996_v7 = vpop.f32.mrb[3].mxu0 }
  0xfe   : > { %v1016_v5 = vadd.f32 %v1015_v2, %v1014_v63  ;;  %v1017_v6 = vpop.f32.mrb[2].mxu1  ;;  %v717_v9 = vadd.f32 %v994_v3, %v360_v0 }
  0xff   : > { %v1018_v8 = vpop.f32.mrb[3].mxu1 }
 0x100   : > { %v757_v10 = vadd.f32 %v1016_v5, %v717_v9 }
 0x11a   : > { %v1036_v11 = vpop.f32.mrb[4].mxu0 }
 0x11b   : > { %v1037_v12 = vpop.f32.mrb[5].mxu0 }
 0x11c   : > { %v1038_v13 = vadd.f32 %v1037_v12, %v1036_v11  ;;  %v1039_v14 = vpop.f32.mrb[6].mxu0 }
 0x11d   : > { %v1040_v16 = vpop.f32.mrb[7].mxu0 }
 0x11e   : > { %v797_v17 = vadd.f32 %v1038_v13, %v757_v10 }
 0x120   : > { %v809_v18 = vadd.f32 %v973_v15, %v797_v17 }
 0x122   : > { %810 = vst [vmem:[%s260_s14] sm:$0xf] %v809_v18 }
 0x123 PF: > { %s14_s17 = sadd.s32 1, %s1139_s17   ;;  %s1368_s15 = smov %s1135_s16 }
 0x124   : > { %p11_p5 = scmp.ge.s32.totalorder %s14_s17, 4   ;;  %s1369_s16 = smov %s1371_s18 }
 0x126   :  { %13 = sbr.rel (!%p11_p5) target bundleno = 2 (0x2), region = 72 }

</bundles_post_ra>
